<compile_context>
chip_gen: v7x
topology: tpu7x:2x2x1
jax: 0.10.0
libtpu: 0.0.40
codegen_flags: <defaults>
</compile_context>

<pallas_src>
import jax
import jax.numpy as jnp
from jax.experimental import pallas as pl
from jax.experimental.pallas import tpu as pltpu

LN_EPS = 1e-5


def _make_lnf_kernel(chunk_rows, n_chunks, affine_in_io_dtype):
    """Builds the LayerNorm kernel for a (tile_rows, hidden) block."""

    def kernel(x_ref, w_ref, b_ref, o_ref):
        out_dtype = o_ref.dtype
        param_dtype = out_dtype if affine_in_io_dtype else jnp.float32
        w = w_ref[...].astype(param_dtype)  # (1, H)
        b = b_ref[...].astype(param_dtype)  # (1, H)

        def process_rows(x):
            xf = x.astype(jnp.float32)
            mean = jnp.mean(xf, axis=-1, keepdims=True)
            mean_sq = jnp.mean(xf * xf, axis=-1, keepdims=True)
            # One-pass variance; clamp to 0 against rounding (review concern).
            var = jnp.maximum(mean_sq - mean * mean, 0.0)
            inv = jax.lax.rsqrt(var + LN_EPS)
            xn = (xf - mean) * inv
            if affine_in_io_dtype:
                return xn.astype(out_dtype) * w + b
            return (xn * w + b).astype(out_dtype)

        if n_chunks == 1:
            o_ref[...] = process_rows(x_ref[...])
        else:
            # Real loop (not unrolled) so the f32 live range stays one chunk.
            def body(c, carry):
                r0 = pl.multiple_of(c * chunk_rows, chunk_rows)
                o_ref[pl.ds(r0, chunk_rows), :] = process_rows(
                    x_ref[pl.ds(r0, chunk_rows), :])
                return carry

            jax.lax.fori_loop(0, n_chunks, body, 0)

    return kernel


def _vmem_capacity_bytes():
    """Best-effort per-core VMEM query; conservative fallback (v7x = 64 MiB)."""
    try:
        info = pltpu.get_tpu_info()
        cap = getattr(info, "vmem_capacity_bytes", None)
        if cap:
            return int(cap)
    except Exception:
        pass
    return 64 * 1024 * 1024


def _choose_tiling(rows, hidden, itemsize):
    """Pick (tile_rows, chunk_rows, n_chunks), sized by bytes not row count."""
    sublane = max(8, 32 // max(1, itemsize))  # 8 f32, 16 bf16, 32 int8
    if rows <= sublane:
        # Full row extent is always a legal block dim, regardless of alignment.
        return rows, rows, 1

    vmem_cap = _vmem_capacity_bytes()
    bytes_per_row = hidden * itemsize
    # One input buffer capped at ~8 MiB (per-step overhead already amortized),
    # and the 4 double-buffered I/O tiles must fit in <= min(VMEM/3, 48 MiB),
    # leaving headroom for the f32 chunk temporaries + compiler scratch (v7x).
    target_io_bytes = 8 << 20
    io_budget = min(vmem_cap // 3, 48 << 20)
    max_rows = min(target_io_bytes // bytes_per_row,
                   io_budget // (4 * bytes_per_row))
    max_rows = max(sublane, (max_rows // sublane) * sublane)

    rows_floor = (rows // sublane) * sublane
    tile_rows = min(max_rows, rows_floor)

    # Bound the in-kernel f32 live range to <=128-row chunks (sublane aligned).
    chunk_rows = min(tile_rows, 128)
    n_chunks = max(1, tile_rows // chunk_rows)
    tile_rows = chunk_rows * n_chunks
    return tile_rows, chunk_rows, n_chunks


def lnf_embedding_forward(hidden_states, weight, bias):
    """LayerNorm (eps=1e-5) over the last dim of hidden_states (..., hidden)."""
    orig_shape = hidden_states.shape
    hidden = orig_shape[-1]
    rows = 1
    for d in orig_shape[:-1]:
        rows *= int(d)
    dtype = hidden_states.dtype
    itemsize = jnp.dtype(dtype).itemsize

    x2d = hidden_states.reshape(rows, hidden)
    w2d = weight.reshape(1, hidden)
    b2d = bias.reshape(1, hidden)

    tile_rows, chunk_rows, n_chunks = _choose_tiling(rows, hidden, itemsize)
    num_blocks = pl.cdiv(rows, tile_rows)

    # 16-bit I/O: run the final affine + cast in the I/O dtype (packs 2/lane on
    # v6e/v7x VPUs); neutral on v5e where the kernel is strictly HBM-bound.
    affine_in_io_dtype = itemsize == 2

    io_tile_bytes = tile_rows * hidden * itemsize
    f32_chunk_bytes = 2 * chunk_rows * hidden * 4  # f32 x + one temp per chunk
    params_bytes = 4 * hidden * itemsize
    needed = 4 * io_tile_bytes + f32_chunk_bytes + params_bytes + (4 << 20)
    vmem_cap = _vmem_capacity_bytes()
    vmem_limit = int(min(max(needed, 32 << 20), (vmem_cap * 3) // 4))

    kernel = _make_lnf_kernel(chunk_rows, n_chunks, affine_in_io_dtype)

    out2d = pl.pallas_call(
        kernel,
        out_shape=jax.ShapeDtypeStruct((rows, hidden), dtype),
        grid_spec=pltpu.PrefetchScalarGridSpec(
            num_scalar_prefetch=0,
            grid=(num_blocks,),
            in_specs=[
                pl.BlockSpec((tile_rows, hidden), lambda i: (i, 0)),
                pl.BlockSpec((1, hidden), lambda i: (0, 0)),
                pl.BlockSpec((1, hidden), lambda i: (0, 0)),
            ],
            out_specs=pl.BlockSpec((tile_rows, hidden), lambda i: (i, 0)),
        ),
        compiler_params=pltpu.CompilerParams(
            # "parallel" shards the row loop across TensorCores on multi-TC
            # chips (v7x); no-op on v5e/v6e.
            # TODO(synk): verify the TC split in an xprof trace on v7x and
            # switch this axis to pltpu.CORE_PARALLEL if it is not split.
            dimension_semantics=("parallel",),
            vmem_limit_bytes=vmem_limit,
        ),
    )(x2d, w2d, b2d)

    return out2d.reshape(orig_shape)


def _reference_lnf(hidden_states, weight, bias):
    x = hidden_states.astype(jnp.float32)
    mean = jnp.mean(x, axis=-1, keepdims=True)
    var = jnp.mean((x - mean) ** 2, axis=-1, keepdims=True)
    y = (x - mean) * jax.lax.rsqrt(var + LN_EPS)
    y = y * weight.astype(jnp.float32) + bias.astype(jnp.float32)
    return y.astype(hidden_states.dtype)


if __name__ == "__main__":
    batch, seq, hidden = 2, 8, 32
    key = jax.random.PRNGKey(0)
    kx, kw, kb = jax.random.split(key, 3)

    hidden_states = jax.random.normal(kx, (batch, seq, hidden), dtype=jnp.float32)
    weight = 1.0 + 0.1 * jax.random.normal(kw, (hidden,), dtype=jnp.float32)
    bias = 0.05 * jax.random.normal(kb, (hidden,), dtype=jnp.float32)

    out = jax.block_until_ready(lnf_embedding_forward(hidden_states, weight, bias))
    ref = _reference_lnf(hidden_states, weight, bias)
    assert out.shape == hidden_states.shape and out.dtype == hidden_states.dtype
    assert jnp.allclose(out, ref, atol=1e-4, rtol=1e-4)

    # Ragged row count (rows % tile != 0): masked last block, no pad/slice.
    hs2 = jax.random.normal(kx, (3, 7, hidden), dtype=jnp.float32)
    out2 = jax.block_until_ready(lnf_embedding_forward(hs2, weight, bias))
    assert jnp.allclose(out2, _reference_lnf(hs2, weight, bias), atol=1e-4, rtol=1e-4)

    # Multi-chunk in-kernel loop path (tile split into 128-row chunks).
    hs3 = jax.random.normal(kx, (4, 96, 128), dtype=jnp.float32)
    w3 = 1.0 + 0.1 * jax.random.normal(kw, (128,), dtype=jnp.float32)
    b3 = 0.05 * jax.random.normal(kb, (128,), dtype=jnp.float32)
    out3 = jax.block_until_ready(lnf_embedding_forward(hs3, w3, b3))
    assert jnp.allclose(out3, _reference_lnf(hs3, w3, b3), atol=1e-4, rtol=1e-4)

    # bf16 I/O path (affine + cast in bf16); compare at bf16 tolerance.
    hs4 = hidden_states.astype(jnp.bfloat16)
    w4 = weight.astype(jnp.bfloat16)
    b4 = bias.astype(jnp.bfloat16)
    out4 = jax.block_until_ready(lnf_embedding_forward(hs4, w4, b4))
    ref4 = _reference_lnf(hs4, w4, b4)
    assert out4.dtype == jnp.bfloat16
    assert jnp.allclose(out4.astype(jnp.float32), ref4.astype(jnp.float32),
                        atol=5e-2, rtol=5e-2)

    print("KERNEL_OK")
</pallas_src>

<mosaic_0001>
module attributes {stable_mosaic.version = 11 : i64} {
  func.func @kernel(%arg0: i32, %arg1: memref<16x32xf32, #tpu.memory_space<vmem>>, %arg2: memref<1x32xf32, #tpu.memory_space<vmem>>, %arg3: memref<1x32xf32, #tpu.memory_space<vmem>>, %arg4: memref<16x32xf32, #tpu.memory_space<vmem>>) attributes {dimension_semantics = [#tpu.dimension_semantics<parallel>], iteration_bounds = array<i64: 1>, scalar_prefetch = 0 : i64, scratch_operands = 0 : i64, tpu.core_type = #tpu.core_type<tc>, window_params = [{transform_indices = @transform_0, window_bounds = array<i64: 16, 32>}, {pipeline_mode = #tpu.pipeline_mode<synchronous>, transform_indices = @transform_1, window_bounds = array<i64: 1, 32>}, {pipeline_mode = #tpu.pipeline_mode<synchronous>, transform_indices = @transform_2, window_bounds = array<i64: 1, 32>}, {transform_indices = @transform_3, window_bounds = array<i64: 16, 32>}]} {
    %c0 = arith.constant 0 : index
    %c0_0 = arith.constant 0 : index
    %0 = vector.load %arg2[%c0, %c0_0] : memref<1x32xf32, #tpu.memory_space<vmem>>, vector<1x32xf32>
    %c0_1 = arith.constant 0 : index
    %c0_2 = arith.constant 0 : index
    %1 = vector.load %arg3[%c0_1, %c0_2] : memref<1x32xf32, #tpu.memory_space<vmem>>, vector<1x32xf32>
    %c0_3 = arith.constant 0 : index
    %c0_4 = arith.constant 0 : index
    %2 = vector.load %arg1[%c0_3, %c0_4] : memref<16x32xf32, #tpu.memory_space<vmem>>, vector<16x32xf32>
    %cst = arith.constant dense<0.000000e+00> : vector<16xf32>
    %3 = vector.multi_reduction <add>, %2, %cst [1] : vector<16x32xf32> to vector<16xf32>
    %4 = vector.shape_cast %3 : vector<16xf32> to vector<16x1xf32>
    %cst_5 = arith.constant 3.200000e+01 : f32
    %5 = vector.broadcast %cst_5 : f32 to vector<16x1xf32>
    %6 = arith.divf %4, %5 : vector<16x1xf32>
    %7 = arith.mulf %2, %2 : vector<16x32xf32>
    %cst_6 = arith.constant dense<0.000000e+00> : vector<16xf32>
    %8 = vector.multi_reduction <add>, %7, %cst_6 [1] : vector<16x32xf32> to vector<16xf32>
    %9 = vector.shape_cast %8 : vector<16xf32> to vector<16x1xf32>
    %cst_7 = arith.constant 3.200000e+01 : f32
    %10 = vector.broadcast %cst_7 : f32 to vector<16x1xf32>
    %11 = arith.divf %9, %10 : vector<16x1xf32>
    %12 = arith.mulf %6, %6 : vector<16x1xf32>
    %13 = arith.subf %11, %12 : vector<16x1xf32>
    %cst_8 = arith.constant 0.000000e+00 : f32
    %14 = vector.broadcast %cst_8 : f32 to vector<16x1xf32>
    %15 = arith.maximumf %13, %14 : vector<16x1xf32>
    %cst_9 = arith.constant 9.99999974E-6 : f32
    %16 = vector.broadcast %cst_9 : f32 to vector<16x1xf32>
    %17 = arith.addf %15, %16 : vector<16x1xf32>
    %18 = math.rsqrt %17 : vector<16x1xf32>
    %19 = vector.broadcast %6 : vector<16x1xf32> to vector<16x32xf32>
    %20 = arith.subf %2, %19 : vector<16x32xf32>
    %21 = vector.broadcast %18 : vector<16x1xf32> to vector<16x32xf32>
    %22 = arith.mulf %20, %21 : vector<16x32xf32>
    %23 = vector.broadcast %0 : vector<1x32xf32> to vector<16x32xf32>
    %24 = arith.mulf %22, %23 : vector<16x32xf32>
    %25 = vector.broadcast %1 : vector<1x32xf32> to vector<16x32xf32>
    %26 = arith.addf %24, %25 : vector<16x32xf32>
    %c0_10 = arith.constant 0 : index
    %c0_11 = arith.constant 0 : index
    %27 = vector.load %arg4[%c0_10, %c0_11] : memref<16x32xf32, #tpu.memory_space<vmem>>, vector<16x32xf32>
    tpu.vector_store %arg4[%c0_10, %c0_11], %26 {strides = array<i32>} : memref<16x32xf32, #tpu.memory_space<vmem>>, vector<16x32xf32>,
    return
  }
  func.func @transform_0(%arg0: i32) -> (i32, i32) {
    %c0_i32 = arith.constant 0 : i32
    %c0_i32_0 = arith.constant 0 : i32
    return %arg0, %c0_i32 : i32, i32
  }
  func.func @transform_1(%arg0: i32) -> (i32, i32) {
    %c0_i32 = arith.constant 0 : i32
    %c0_i32_0 = arith.constant 0 : i32
    %c0_i32_1 = arith.constant 0 : i32
    return %c0_i32, %c0_i32_0 : i32, i32
  }
  func.func @transform_2(%arg0: i32) -> (i32, i32) {
    %c0_i32 = arith.constant 0 : i32
    %c0_i32_0 = arith.constant 0 : i32
    %c0_i32_1 = arith.constant 0 : i32
    return %c0_i32, %c0_i32_0 : i32, i32
  }
  func.func @transform_3(%arg0: i32) -> (i32, i32) {
    %c0_i32 = arith.constant 0 : i32
    %c0_i32_0 = arith.constant 0 : i32
    return %arg0, %c0_i32 : i32, i32
  }
}

</mosaic_0001>

<bundles_post_ra>
// kernel: tpu_custom_call.1
= control target key start
LH: loop header
LB: loop body
LE: loop exit
PB: predicated region body
PF: predicated region fallthrough
CT: control target
= control target key end

     0   :  { %8 = vsyncpa [#allocation3], 0  ;;  %s226_s0 = inlined_call_operand.hbm [shape: f32[16,32], index: 0, kind: input, shape index: {}]   ;;  %s227_s1 = inlined_call_operand.vmem [shape: f32[1,32], index: 1, kind: input, shape index: {}]   ;;  %s228_s2 = inlined_call_operand.vmem [shape: f32[1,32], index: 2, kind: input, shape index: {}]   ;;  %s229_s3 = inlined_call_operand.hbm [shape: f32[16,32], index: 3, kind: output, shape index: {}]  }
   0x1   :  { %9 = vsyncpa [#allocation4], 0  ;;  %s160_s12 = smov [#allocation2]   ;;  %s112_s16 = scalar_lea.hbm %s226_s0, 256 }
   0x2   :  { %s15_s13 = sshll.u32 %s160_s12, 4  ;;  %p113_p0 = scmp.ne.s32.totalorder %s226_s0, %s112_s16  ;;  %s16_s13 = int_to_ptr.vmem [resolvable:$true] %s15_s13 }
   0x3   :  { %p116_p1 = scmp.lt.u32.totalorder %s112_s16, %s226_s0 }
   0x5   :  { %p118_p2 = pnand %p116_p1, %p113_p0 }
   0x7   :  { %121 = shalt.err (!%p118_p2)
}
   0x8   :  { %s122_s21 = scalar_lea.vmem %s16_s13, 256  ;;  %p127_p4 = scmp.lt.s32.totalorder %s16_s13, %s16_s13 }
   0x9   :  { %p123_p3 = scmp.ne.s32.totalorder %s16_s13, %s122_s21  ;;  %p128_p5 = scmp.lt.s32.totalorder %s122_s21, %s122_s21 }
   0xb   :  { %p129_p6 = por %p128_p5, %p127_p4 }
   0xd   :  { %p130_p7 = pnand %p129_p6, %p123_p3 }
   0xf   :  { %133 = shalt.err (!%p130_p7)
}
  0x10   :  { %s161_s22 = smov 128   ;;  %s162_s23 = smov 8  }
  0x11   :  { %21 = dma.hbm_to_vmem [thread:$0]  %s226_s0, 256, %s16_s13, [#allocation3], %s161_s22, %s161_s22, %s162_s23  }
  0x12   :  { %156 = dma.done.wait [#allocation3], 256  }
  0x13   :  { %157 = vsyncadd [#allocation3], 4294967040  ;;  %vm33_vm0 = vcmask 261120   ;;  %v31_v0 = vld [vmem:[#allocation2] sm:$0xff]  ;;  %v32_v1 = vld [vmem:[#allocation2 + $0x8] sm:$0xff]  ;;  %s163_s29 = smov [#allocation5]  }
  0x14   :  { %v34_v2 = vsel %vm33_vm0, %v31_v0, 0.0  ;;  %v43_v3 = vmul.f32 %v31_v0, %v31_v0  ;;  %v44_v4 = vmul.f32 %v32_v1, %v32_v1  ;;  %v37_v6 = vsel %vm33_vm0, %v32_v1, 0.0  ;;  %v102_v26 = vld [vmem:[%s227_s1] ss:$0 sm:$0xff]  ;;  %s90_s30 = sshll.u32 %s163_s29, 4  ;;  %s91_s30 = int_to_ptr.vmem [resolvable:$true] %s90_s30 }
  0x15   :  { %35 = vadd.xlane.f32.xlu0 %v34_v2  ;;  %v103_v28 = vld [vmem:[%s228_s2] ss:$0 sm:$0xff]  ;;  %s134_s1 = scalar_lea.vmem %s91_s30, 256  ;;  %p139_p9 = scmp.lt.s32.totalorder %s91_s30, %s91_s30 }
  0x16   :  { %v45_v5 = vsel %vm33_vm0, %v43_v3, 0.0  ;;  %v48_v7 = vsel %vm33_vm0, %v44_v4, 0.0  ;;  %p135_p8 = scmp.ne.s32.totalorder %s91_s30, %s134_s1  ;;  %p140_p10 = scmp.lt.s32.totalorder %s134_s1, %s134_s1 }
  0x17   :  { %46 = vadd.xlane.f32.xlu1 %v45_v5 }
  0x18   :  { %p141_p11 = por %p140_p10, %p139_p9 }
  0x19   :  { %38 = vadd.xlane.f32.xlu0 %v37_v6 }
  0x1a   :  { %p142_p12 = pnand %p141_p11, %p135_p8 }
  0x1b   :  { %49 = vadd.xlane.f32.xlu1 %v48_v7 }
  0xa2   :  { %v36_v8 = vpop.xlane.xlu0 %35 }
  0xa3   :  { %v41_v9 = vmul.f32 0.03125, %v36_v8 }
  0xa4   :  { %v47_v10 = vpop.xlane.xlu1 %46 }
  0xa5   :  { %v53_v11 = vmul.f32 %v41_v9, %v41_v9  ;;  %v51_v12 = vmul.f32 0.03125, %v47_v10  ;;  %v63_v24 = vsub.f32 %v31_v0, %v41_v9 }
  0xa6   :  { %v39_v13 = vpop.xlane.xlu0 %38 }
  0xa7   :  { %v55_v14 = vsub.f32 %v51_v12, %v53_v11  ;;  %v42_v15 = vmul.f32 0.03125, %v39_v13 }
  0xa8   :  { %v50_v16 = vpop.xlane.xlu1 %49 }
  0xa9   :  { %v57_v17 = vmax.f32 %v55_v14, 0.0  ;;  %v54_v18 = vmul.f32 %v42_v15, %v42_v15  ;;  %v52_v19 = vmul.f32 0.03125, %v50_v16  ;;  %v64_v29 = vsub.f32 %v32_v1, %v42_v15 }
  0xab   :  { %v59_v20 = vadd.f32 1e-05, %v57_v17  ;;  %v56_v21 = vsub.f32 %v52_v19, %v54_v18 }
  0xad   :  { %108 = vrsqrt.f32 %v59_v20  ;;  %v58_v22 = vmax.f32 %v56_v21, 0.0 }
  0xaf   :  { %v60_v23 = vadd.f32 1e-05, %v58_v22 }
  0xb1   :  { %110 = vrsqrt.f32 %v60_v23 }
  0xb7   :  { %v109_v25 = vpop.eup %108 }
  0xb8   :  { %v65_v27 = vmul.f32 %v109_v25, %v63_v24 }
  0xba   :  { %v73_v30 = vmul.f32 %v102_v26, %v65_v27 }
  0xbb   :  { %v111_v31 = vpop.eup %110 }
  0xbc   :  { %v66_v32 = vmul.f32 %v111_v31, %v64_v29  ;;  %v81_v33 = vadd.f32 %v103_v28, %v73_v30 }
  0xbe   :  { %v74_v34 = vmul.f32 %v102_v26, %v66_v32  ;;  %83 = vst.msk [vmem:[#allocation5] sm:$0xff] %vm33_vm0, %v81_v33 }
  0xc0   :  { %v82_v35 = vadd.f32 %v103_v28, %v74_v34 }
  0xc2   :  { %84 = vst.msk [vmem:[#allocation5 + $0x8] sm:$0xff] %vm33_vm0, %v82_v35 }
  0xc3   :  { %145 = shalt.err (!%p142_p12)
}
  0xc4   :  { %s146_s5 = scalar_lea.hbm %s229_s3, 256 }
  0xc5   :  { %p147_p13 = scmp.ne.s32.totalorder %s229_s3, %s146_s5  ;;  %p150_p0 = scmp.lt.u32.totalorder %s146_s5, %s229_s3 }
  0xc7   :  { %p152_p1 = pnand %p150_p0, %p147_p13 }
  0xc9   :  { %155 = shalt.err (!%p152_p1)
}
  0xca   :  { %96 = dma.vmem_to_hbm [thread:$0]  %s91_s30, 256, %s229_s3, [#allocation4], %s161_s22, %s161_s22, %s162_s23  }
  0xcb   :  { %158 = dma.done.wait [#allocation4], 256  }
  0xcc   :  { %159 = vsyncadd [#allocation4], 4294967040 }
  0xcd   :  { %100 = vsyncpa [#allocation3], 1 }
  0xce   :  { %101 = vsyncpa [#allocation4], 1 }

</bundles_post_ra>
